<compile_context>
chip_gen: v5e
topology: v5e:2x2
jax: 0.10.0
libtpu: 0.0.40
codegen_flags: <defaults>
</compile_context>

<pallas_src>
import jax
import jax.numpy as jnp
from jax.experimental import pallas as pl
from jax.experimental.pallas import tpu as pltpu


def _round_up(x, m):
    return ((x + m - 1) // m) * m


def _choose_pixel_tile(hw_padded, cin, c4p, itemsize,
                       target=2048, budget_bytes=24 * 1024 * 1024):
    """Largest multiple of 128 that divides hw_padded, is <= target, and whose
    double-buffered x/out tiles fit a (v7x-safe) VMEM budget."""
    cand = (min(target, hw_padded) // 128) * 128
    while cand >= 128:
        if hw_padded % cand == 0:
            need = 2 * (cin + c4p) * cand * itemsize
            if need <= budget_bytes:
                return cand
        cand -= 128
    return 128  # hw_padded is a multiple of 128, so this always divides


def _upconv_kernel(x_ref, w_ref, b_ref, o_ref):
    # x_ref: (1, Cin, Tpix)   w_ref: (C4p, Cin)   b_ref: (C4p, 1) f32
    # o_ref: (1, C4p, Tpix)
    acc = jnp.dot(w_ref[...], x_ref[0], preferred_element_type=jnp.float32)
    o_ref[0] = (acc + b_ref[...]).astype(o_ref.dtype)


def up_concat(inputs_nchw, down_outputs_nchw, weight, bias):
    """Pallas implementation of UpConcat.forward.

    inputs_nchw:       (N, Cin, H, W)
    down_outputs_nchw: (N, Cd, 2H, 2W)
    weight:            (Cin, Cout, 2, 2)   (PyTorch ConvTranspose2d layout)
    bias:              (Cout,)
    returns:           (N, Cd + Cout, 2H, 2W)
    """
    N, Cin, H, W = inputs_nchw.shape
    Cout = weight.shape[1]
    HW = H * W
    C4 = 4 * Cout
    C4p = _round_up(C4, 8)                       # sublane-aligned matmul rows

    compute_dtype = inputs_nchw.dtype            # pass bf16 inputs for bf16 MXU
    itemsize = jnp.dtype(compute_dtype).itemsize

    HWp = _round_up(HW, 128)                     # lane-aligned spatial extent
    Tpix = _choose_pixel_tile(HWp, Cin, C4p, itemsize)

    # --- operand prep (reshapes are free; pad only when HW % 128 != 0) ---
    x3 = inputs_nchw.reshape(N, Cin, HW).astype(compute_dtype)
    if HWp != HW:
        x3 = jnp.pad(x3, ((0, 0), (0, 0), (0, HWp - HW)))

    # (Cin, Cout, 2, 2) -> (Cout, 2, 2, Cin) -> (4*Cout, Cin); row = co*4+dh*2+dw
    w2 = jnp.transpose(weight, (1, 2, 3, 0)).reshape(C4, Cin).astype(compute_dtype)
    b2 = jnp.repeat(bias.astype(jnp.float32), 4)         # row co*4+k -> bias[co]
    if C4p != C4:
        w2 = jnp.pad(w2, ((0, C4p - C4), (0, 0)))
        b2 = jnp.pad(b2, (0, C4p - C4))
    b2 = b2.reshape(C4p, 1)

    grid = (N, HWp // Tpix)

    # VMEM: double-buffered x/out tiles + (conservatively double-buffered) w/b
    vmem_need = 2 * (Cin + C4p) * Tpix * itemsize
    vmem_need += 2 * C4p * Cin * itemsize + 2 * C4p * 4
    vmem_need += 2 << 20                                   # margin
    vmem_limit = int(min(max(vmem_need, 32 << 20), 128 << 20))

    cost = pl.CostEstimate(
        flops=2 * N * HWp * Cin * C4p,
        transcendentals=0,
        bytes_accessed=(N * Cin * HWp * itemsize          # x read
                        + C4p * Cin * itemsize + C4p * 4  # weights + bias
                        + N * C4p * HWp * itemsize),      # output write
    )

    y_raw = pl.pallas_call(
        _upconv_kernel,
        out_shape=jax.ShapeDtypeStruct((N, C4p, HWp), compute_dtype),
        grid_spec=pltpu.PrefetchScalarGridSpec(
            num_scalar_prefetch=0,
            grid=grid,
            in_specs=[
                pl.BlockSpec((1, Cin, Tpix), lambda n, p: (n, 0, p)),
                pl.BlockSpec((C4p, Cin), lambda n, p: (0, 0)),
                pl.BlockSpec((C4p, 1), lambda n, p: (0, 0)),
            ],
            out_specs=pl.BlockSpec((1, C4p, Tpix), lambda n, p: (n, 0, p)),
        ),
        compiler_params=pltpu.CompilerParams(
            dimension_semantics=("parallel", "parallel"),
            vmem_limit_bytes=vmem_limit,
        ),
        cost_estimate=cost,
    )(x3, w2, b2)

    # TODO(synk): fuse the 2x interleave + channel concat into the kernel's store
    # (needs a lane-level relayout in Mosaic); for now it is one post-kernel XLA
    # fusion: slice/reshape/transpose/concat all collapse into a single pass.
    y = y_raw[:, :C4, :HW].reshape(N, Cout, 2, 2, H, W)
    y = jnp.transpose(y, (0, 1, 4, 2, 5, 3)).reshape(N, Cout, 2 * H, 2 * W)
    return jnp.concatenate(
        [down_outputs_nchw, y.astype(down_outputs_nchw.dtype)], axis=1)


def _reference(inputs_nchw, down_outputs_nchw, weight, bias):
    # pure-JAX reference for ConvTranspose2d(k=2, s=2) + concat (no Pallas)
    y = jnp.einsum("nchw,cokl->nohwkl", inputs_nchw, weight)
    N, Co, H, W, _, _ = y.shape
    y = jnp.transpose(y, (0, 1, 2, 4, 3, 5)).reshape(N, Co, 2 * H, 2 * W)
    y = y + bias[None, :, None, None]
    return jnp.concatenate([down_outputs_nchw, y], axis=1)


if __name__ == "__main__":
    in_feat, out_feat = 8, 4
    N, H, W = 2, 16, 16
    down_C = 4

    key = jax.random.PRNGKey(0)
    k1, k2, k3, k4 = jax.random.split(key, 4)

    x = jax.random.normal(k1, (N, in_feat, H, W), dtype=jnp.float32)
    down = jax.random.normal(k2, (N, down_C, 2 * H, 2 * W), dtype=jnp.float32)
    # ConvTranspose2d weight layout: (Cin, Cout, 2, 2)
    weight = jax.random.normal(k3, (in_feat, out_feat, 2, 2), dtype=jnp.float32) * 0.1
    bias = jax.random.normal(k4, (out_feat,), dtype=jnp.float32) * 0.1

    fn = jax.jit(up_concat)
    out = jax.block_until_ready(fn(x, down, weight, bias))

    ref = _reference(x, down, weight, bias)
    assert out.shape == (N, down_C + out_feat, 2 * H, 2 * W), out.shape
    assert jnp.allclose(out, ref, atol=1e-5, rtol=1e-5), "mismatch vs reference"

    print("KERNEL_OK")
</pallas_src>

<mosaic_0001>
module attributes {stable_mosaic.version = 11 : i64} {
  func.func @_upconv_kernel(%arg0: i32, %arg1: i32, %arg2: memref<1x8x256xf32, #tpu.memory_space<vmem>>, %arg3: memref<16x8xf32, #tpu.memory_space<vmem>>, %arg4: memref<16x1xf32, #tpu.memory_space<vmem>>, %arg5: memref<1x16x256xf32, #tpu.memory_space<vmem>>) attributes {dimension_semantics = [#tpu.dimension_semantics<parallel>, #tpu.dimension_semantics<parallel>], iteration_bounds = array<i64: 2, 1>, scalar_prefetch = 0 : i64, scratch_operands = 0 : i64, tpu.core_type = #tpu.core_type<tc>, window_params = [{transform_indices = @transform_0, window_bounds = array<i64: 1, 8, 256>}, {pipeline_mode = #tpu.pipeline_mode<synchronous>, transform_indices = @transform_1, window_bounds = array<i64: 16, 8>}, {pipeline_mode = #tpu.pipeline_mode<synchronous>, transform_indices = @transform_2, window_bounds = array<i64: 16, 1>}, {transform_indices = @transform_3, window_bounds = array<i64: 1, 16, 256>}]} {
    %c0 = arith.constant 0 : index
    %c0_0 = arith.constant 0 : index
    %0 = vector.load %arg3[%c0, %c0_0] : memref<16x8xf32, #tpu.memory_space<vmem>>, vector<16x8xf32>
    %c0_1 = arith.constant 0 : index
    %c0_2 = arith.constant 0 : index
    %c0_3 = arith.constant 0 : index
    %1 = vector.load %arg2[%c0_1, %c0_2, %c0_3] : memref<1x8x256xf32, #tpu.memory_space<vmem>>, vector<1x8x256xf32>
    %2 = vector.shape_cast %1 : vector<1x8x256xf32> to vector<8x256xf32>
    %cst = arith.constant dense<0.000000e+00> : vector<16x256xf32>
    %3 = tpu.matmul %0, %2, %cst {dimension_numbers = #tpu.dot_dimension_numbers<[1], [0], [0], [1], [0, 0, 1, 1], [], []>} : vector<16x8xf32>, vector<8x256xf32>, vector<16x256xf32> -> vector<16x256xf32>
    %c0_4 = arith.constant 0 : index
    %c0_5 = arith.constant 0 : index
    %4 = vector.load %arg4[%c0_4, %c0_5] : memref<16x1xf32, #tpu.memory_space<vmem>>, vector<16x1xf32>
    %5 = vector.broadcast %4 : vector<16x1xf32> to vector<16x256xf32>
    %6 = arith.addf %3, %5 : vector<16x256xf32>
    %c0_6 = arith.constant 0 : index
    %c0_7 = arith.constant 0 : index
    %c0_8 = arith.constant 0 : index
    %7 = vector.load %arg5[%c0_6, %c0_7, %c0_8] : memref<1x16x256xf32, #tpu.memory_space<vmem>>, vector<1x16x256xf32>
    %8 = vector.shape_cast %7 : vector<1x16x256xf32> to vector<16x256xf32>
    %9 = vector.shape_cast %6 : vector<16x256xf32> to vector<1x16x256xf32>
    tpu.vector_store %arg5[%c0_6, %c0_7, %c0_8], %9 {strides = array<i32>} : memref<1x16x256xf32, #tpu.memory_space<vmem>>, vector<1x16x256xf32>,
    return
  }
  func.func @transform_0(%arg0: i32, %arg1: i32) -> (i32, i32, i32) {
    %c0_i32 = arith.constant 0 : i32
    %c0_i32_0 = arith.constant 0 : i32
    return %arg0, %c0_i32, %arg1 : i32, i32, i32
  }
  func.func @transform_1(%arg0: i32, %arg1: i32) -> (i32, i32) {
    %c0_i32 = arith.constant 0 : i32
    %c0_i32_0 = arith.constant 0 : i32
    %c0_i32_1 = arith.constant 0 : i32
    return %c0_i32, %c0_i32_0 : i32, i32
  }
  func.func @transform_2(%arg0: i32, %arg1: i32) -> (i32, i32) {
    %c0_i32 = arith.constant 0 : i32
    %c0_i32_0 = arith.constant 0 : i32
    %c0_i32_1 = arith.constant 0 : i32
    return %c0_i32, %c0_i32_0 : i32, i32
  }
  func.func @transform_3(%arg0: i32, %arg1: i32) -> (i32, i32, i32) {
    %c0_i32 = arith.constant 0 : i32
    %c0_i32_0 = arith.constant 0 : i32
    return %arg0, %c0_i32, %arg1 : i32, i32, i32
  }
}

</mosaic_0001>

<bundles_post_ra>
// kernel: up_concat.1
= control target key start
LH: loop header
LB: loop body
LE: loop exit
PB: predicated region body
PF: predicated region fallthrough
CT: control target
= control target key end

     0   :  { %s460_s12 = smov 0   ;;  %s462_s13 = smov 0   ;;  %s505_s0 = inlined_call_operand.vmem [shape: f32[2,8,256], index: 0, kind: input, shape index: {}]   ;;  %s506_s1 = inlined_call_operand.vmem [shape: f32[16,8], index: 1, kind: input, shape index: {}]   ;;  %s507_s2 = inlined_call_operand.vmem [shape: f32[16,1], index: 2, kind: input, shape index: {}]   ;;  %s508_s3 = inlined_call_operand.vmem [shape: f32[2,16,256], index: 3, kind: output, shape index: {}]  }
   0x1   :  { %s464_s14 = smov 0  }
   0x2 LB: > { %s25_s15 = sadd.s32 1, %s433_s13  ;;  %p374_p0 = scmp.ge.s32.totalorder %s437_s14, 1  ;;  %s437_s14 = sphi %s464_s14, %s13_s14   ;;  %s433_s13 = sphi %s462_s13, %s510_s13   ;;  %s429_s12 = sphi %s460_s12, %s509_s12  }
   0x3   : > { %p27_p1 = scmp.ge.s32.totalorder %s25_s15, 2  ;;  %p158_p2 = scmp.lt.s32.totalorder %s437_s14, 3 }
   0x5   : > { %s512_s15 = smov (%p27_p1, %s25_s15), 0  ;;  %p159_p3 = pnand %p374_p0, %p158_p2 }
   0x6   : > { %p191_p4 = scmp.lt.s32.totalorder (!%p159_p3), %s429_s12, 1 }
   0x7   : > { %162 = sbr.rel (%p159_p3) target bundleno = 154 (0x9a), region = 32 }
   0xc   : > { %v214_v0 = vld [vmem:[%s507_s2] sm:$0xff]  ;;  %v439_v1 = vmov 0   ;;  %s514_s12 = smov (!%p191_p4, %s429_s12), 1  ;;  %vm226_vm0 = vcmask 64512   ;;  %v211_v5 = vld [vmem:[%s506_s1 + $0x8] sm:$0xff] }
   0xd   : > { %414 = vset.pattern.permute.xlu0 %v439_v1  ;;  %s385_s18 = sshll.u32 %s514_s12, 4  ;;  %v210_v2 = vld [vmem:[%s506_s1] sm:$0xff]  ;;  %v215_v6 = vld [vmem:[%s507_s2 + $0x8] sm:$0xff]  ;;  %s386_s28 = sshll.u32 %s514_s12, 5 }
   0xe   : > { %218 = vperm.xlu0 %414, %v214_v0   ;;  %s198_s21 = scalar_lea.vmem %s505_s0, %s385_s18  ;;  %s208_s4 = scalar_lea.vmem %s508_s3, %s386_s28 }
   0xf   : > { %v212_v3 = vld [vmem:[%s198_s21] sm:$0xff]  ;;  %v213_v4 = vld [vmem:[%s198_s21 + $0x8] sm:$0xff] }
  0x10   : > { %248 = vmatpush.msra.mxu0 %v212_v3  ;;  %387 = vmatpush.msra.mxu2 %v212_v3 }
  0x11   : > { %271 = vmatpush.msra.mxu1 %v213_v4  ;;  %388 = vmatpush.msra.mxu3 %v213_v4 }
  0x12   : > { %379 = vmatmul.msk.f32.vlgmr.msra.gmra.mxu0 %vm226_vm0, %v210_v2  ;;  %380 = vmatmul.msk.f32.vlgmr.msra.gmra.mxu2 %vm226_vm0, %v211_v5 }
  0x13   : > { %381 = vmatmul.msk.f32.vlgmr.msra.gmra.mxu1 %vm226_vm0, %v210_v2  ;;  %382 = vmatmul.msk.f32.vlgmr.msra.gmra.mxu3 %vm226_vm0, %v211_v5 }
  0x16   : > { %223 = vperm.xlu0 %414, %v215_v6  }
  0x80   : > { %v219_v7 = vpop.permute.xlu0 %218 }
  0x88   : > { %v224_v12 = vpop.permute.xlu0 %223 }
  0x8f   : > { %v250_v8 = vpop.f32.mrf.mxu0 }
  0x90   : > { %v251_v9 = vadd.f32 %v250_v8, %v219_v7  ;;  %v273_v10 = vpop.f32.mrf.mxu1 }
  0x91   : > { %v274_v11 = vadd.f32 %v273_v10, %v219_v7 }
  0x92   : > { %279 = vst [vmem:[%s208_s4] sm:$0xff] %v251_v9 }
  0x93   : > { %280 = vst [vmem:[%s208_s4 + $0x8] sm:$0xff] %v274_v11 }
  0x95   : > { %v253_v13 = vpop.f32.mrf.mxu2 }
  0x96   : > { %v254_v14 = vadd.f32 %v253_v13, %v224_v12  ;;  %v276_v15 = vpop.f32.mrf.mxu3 }
  0x97   : > { %v277_v16 = vadd.f32 %v276_v15, %v224_v12 }
  0x98   : > { %281 = vst [vmem:[%s208_s4 + $0x10] sm:$0xff] %v254_v14 }
  0x99   : > { %282 = vst [vmem:[%s208_s4 + $0x18] sm:$0xff] %v277_v16 }
  0x9a PF: > { %s13_s14 = sadd.s32 1, %s437_s14   ;;  %s509_s12 = smov %s433_s13 }
  0x9b   : > { %p10_p5 = scmp.ge.s32.totalorder %s13_s14, 4   ;;  %s510_s13 = smov %s512_s15 }
  0x9d   :  { %12 = sbr.rel (!%p10_p5) target bundleno = 2 (0x2), region = 62 }

</bundles_post_ra>
